<compile_context>
chip_gen: v5e
topology: v5e:2x2
jax: 0.10.0
libtpu: 0.0.40
codegen_flags: <defaults>
</compile_context>

<pallas_src>
import jax
import jax.numpy as jnp
import numpy as np
from jax import lax
from jax.experimental import pallas as pl
from jax.experimental.pallas import tpu as pltpu


def _round_up(x, m):
    return (x + m - 1) // m * m


def _deephit_rank_kernel(preds_j_ref, didx_ref, g_ref, dur_i_ref, ev_i_ref,
                         dur_j_ref, acc_ref, onehot_ref):
    """Elementwise-accumulates ranking terms for one (i-tile, j-tile) pair."""
    j = pl.program_id(1)

    @pl.when(j == 0)
    def _():
        # Per-i-tile setup, amortized over all j steps: build the one-hot
        # gather matrix and zero the resident elementwise accumulator.
        di = didx_ref[...]                                        # (TI, 1) int32
        ti, t = onehot_ref.shape
        t_iota = lax.broadcasted_iota(jnp.int32, (ti, t), 1)
        onehot_ref[...] = (t_iota == di).astype(jnp.float32)
        acc_ref[...] = jnp.zeros_like(acc_ref)

    # Pg[a, b] = preds_j[b, dur_idx_i[a]] via MXU matmul with the one-hot.
    pg = lax.dot_general(onehot_ref[...], preds_j_ref[...],
                         (((1,), (1,)), ((), ())),
                         preferred_element_type=jnp.float32,
                         precision=lax.Precision.HIGHEST)        # (TI, TJ)
    mask = (dur_i_ref[...] < dur_j_ref[...]) & (ev_i_ref[...] == 1.0)
    # Pure VPU elementwise accumulate; no per-step cross-lane reduction.
    acc_ref[...] += jnp.where(mask, jnp.maximum(pg - g_ref[...], 0.0), 0.0)


def _pick_i_tile(B, max_tile=256):
    if B <= 128:
        return max(_round_up(B, 8), 8)
    if B <= 2 * max_tile:
        # Ensure n_i >= 2 so the "parallel" i axis lands on both TCs (v7x).
        return max(_round_up((B + 1) // 2, 8), 8)
    return max_tile


def deephit_loss(preds, targets, *, alpha=0.5, event_weight=1.0,
                 censored_weight=1.0):
    """Pallas implementation of DeepHitLoss.forward(preds, targets)."""
    preds = preds.astype(jnp.float32)
    B, T = preds.shape
    dur = targets[:, 0].astype(jnp.float32)
    ev = targets[:, 1].astype(jnp.float32)

    # --- O(B) / O(B log B) pieces stay in the wrapper. ---
    dur_max = jnp.maximum(jnp.max(dur), 1e-8)
    dur_idx = (dur / dur_max * (T - 1)).astype(jnp.int32)
    g = jnp.take_along_axis(preds, dur_idx[:, None], axis=1)[:, 0]   # (B,)
    w = jnp.where(ev == 1.0, event_weight, censored_weight)
    lik_sum = jnp.sum(-jnp.log(g + 1e-8) * ev * w)

    # cnt = sum_i ev_i * #{j : dur_j > dur_i}, via sort + searchsorted.
    sorted_dur = jnp.sort(dur)
    n_greater = (B - jnp.searchsorted(sorted_dur, dur, side="right")
                 ).astype(jnp.float32)
    cnt = jnp.sum(ev * n_greater)

    # --- Tiled O(B^2) ranking term. ---
    ti = _pick_i_tile(B)          # sublane (i) tile
    tj = 128                      # lane (j) tile: 128-wide strips, no spilling
    bpi = _round_up(B, ti)
    bpj = _round_up(B, tj)
    n_i = bpi // ti
    n_j = bpj // tj
    pad_i = bpi - B
    pad_j = bpj - B

    preds_j = jnp.pad(preds, ((0, pad_j), (0, 0)))
    didx_col = jnp.pad(dur_idx, (0, pad_i)).reshape(bpi, 1)
    g_col = jnp.pad(g, (0, pad_i)).reshape(bpi, 1)
    dur_col = jnp.pad(dur, (0, pad_i)).reshape(bpi, 1)
    ev_col = jnp.pad(ev, (0, pad_i)).reshape(bpi, 1)   # padded ev=0 -> mask False
    # Padded j entries get -1e30 so (dur_i < dur_j) is always False for them.
    dur_row = jnp.pad(dur, (0, pad_j), constant_values=-1e30).reshape(1, bpj)

    acc = pl.pallas_call(
        _deephit_rank_kernel,
        out_shape=jax.ShapeDtypeStruct((bpi, tj), jnp.float32),
        grid_spec=pltpu.PrefetchScalarGridSpec(
            num_scalar_prefetch=0,
            grid=(n_i, n_j),
            in_specs=[
                pl.BlockSpec((tj, T), lambda i, j: (j, 0)),      # preds, j-tile
                pl.BlockSpec((ti, 1), lambda i, j: (i, 0)),      # dur_idx, i col
                pl.BlockSpec((ti, 1), lambda i, j: (i, 0)),      # g, i col
                pl.BlockSpec((ti, 1), lambda i, j: (i, 0)),      # durations, i col
                pl.BlockSpec((ti, 1), lambda i, j: (i, 0)),      # events, i col
                pl.BlockSpec((1, tj), lambda i, j: (0, j)),      # durations, j row
            ],
            out_specs=pl.BlockSpec((ti, tj), lambda i, j: (i, 0)),
            scratch_shapes=[pltpu.VMEM((ti, T), jnp.float32)],   # one-hot gather
        ),
        compiler_params=pltpu.CompilerParams(
            dimension_semantics=("parallel", "arbitrary")),
    )(preds_j, didx_col, g_col, dur_col, ev_col, dur_row)

    # Tiny final reduction of the elementwise accumulator.
    rank_sum = jnp.sum(acc)
    rank_loss = jnp.where(cnt > 0.0,
                          rank_sum * event_weight / jnp.maximum(cnt, 1.0), 0.0)
    return alpha * lik_sum / B + (1.0 - alpha) * rank_loss


def deephit_loss_ref(preds, targets, *, alpha=0.5, event_weight=1.0,
                     censored_weight=1.0):
    """Pure-JAX reference mirroring the PyTorch forward."""
    preds = preds.astype(jnp.float32)
    B, T = preds.shape
    dur = targets[:, 0].astype(jnp.float32)
    ev = targets[:, 1].astype(jnp.float32)
    di = (dur / dur.max() * (T - 1)).astype(jnp.int32)
    g = preds[jnp.arange(B), di]
    lik = -jnp.log(g + 1e-8) * ev
    w = jnp.where(ev == 1.0, event_weight, censored_weight)
    lik = lik * w
    Pg = preds[:, di].T                              # Pg[i, j] = preds[j, di[i]]
    mask = (dur[:, None] < dur[None, :]) & (ev[:, None] == 1.0)
    rank_terms = jnp.maximum(Pg - g[:, None], 0.0) * event_weight * mask
    cnt = jnp.sum(mask)
    rank = jnp.where(cnt > 0, jnp.sum(rank_terms) / jnp.maximum(cnt, 1), 0.0)
    return jnp.mean(alpha * lik + (1.0 - alpha) * rank)


if __name__ == "__main__":
    key = jax.random.PRNGKey(0)
    k1, k2, k3 = jax.random.split(key, 3)

    # Small shapes matching the module's expected inputs.
    B, T = 8, 16
    preds = jax.nn.softmax(jax.random.normal(k1, (B, T)), axis=-1)
    durations = jax.random.uniform(k2, (B,), minval=0.1, maxval=10.0)
    events = jax.random.bernoulli(k3, 0.6, (B,)).astype(jnp.float32)
    targets = jnp.stack([durations, events], axis=1)             # (B, 2)

    loss = jax.block_until_ready(
        deephit_loss(preds, targets, alpha=0.5, event_weight=1.0,
                     censored_weight=1.0))
    loss_ref = deephit_loss_ref(preds, targets, alpha=0.5, event_weight=1.0,
                                censored_weight=1.0)
    np.testing.assert_allclose(np.asarray(loss), np.asarray(loss_ref),
                               rtol=1e-5, atol=1e-6)

    # Exercise the multi-tile (gridded) path with batch padding and weights;
    # B=300 gives n_i=2 (both TCs on v7x) and n_j=3 (resident accumulator).
    kb1, kb2, kb3 = jax.random.split(jax.random.PRNGKey(1), 3)
    B2, T2 = 300, 32
    preds2 = jax.nn.softmax(jax.random.normal(kb1, (B2, T2)), axis=-1)
    dur2 = jax.random.uniform(kb2, (B2,), minval=0.1, maxval=10.0)
    ev2 = jax.random.bernoulli(kb3, 0.6, (B2,)).astype(jnp.float32)
    targets2 = jnp.stack([dur2, ev2], axis=1)
    loss2 = jax.block_until_ready(
        deephit_loss(preds2, targets2, alpha=0.4, event_weight=1.5,
                     censored_weight=0.5))
    loss2_ref = deephit_loss_ref(preds2, targets2, alpha=0.4, event_weight=1.5,
                                 censored_weight=0.5)
    np.testing.assert_allclose(np.asarray(loss2), np.asarray(loss2_ref),
                               rtol=1e-4, atol=1e-5)

    print("KERNEL_OK")
</pallas_src>

<mosaic_0001>
module attributes {stable_mosaic.version = 11 : i64} {
  func.func @_deephit_rank_kernel(%arg0: i32, %arg1: i32, %arg2: memref<128x16xf32, #tpu.memory_space<vmem>>, %arg3: memref<8x1xi32, #tpu.memory_space<vmem>>, %arg4: memref<8x1xf32, #tpu.memory_space<vmem>>, %arg5: memref<8x1xf32, #tpu.memory_space<vmem>>, %arg6: memref<8x1xf32, #tpu.memory_space<vmem>>, %arg7: memref<1x128xf32, #tpu.memory_space<vmem>>, %arg8: memref<8x128xf32, #tpu.memory_space<vmem>>, %arg9: memref<8x16xf32, #tpu.memory_space<vmem>>) attributes {dimension_semantics = [#tpu.dimension_semantics<parallel>, #tpu.dimension_semantics<arbitrary>], iteration_bounds = array<i64: 1, 1>, scalar_prefetch = 0 : i64, scratch_operands = 1 : i64, tpu.core_type = #tpu.core_type<tc>, window_params = [{transform_indices = @transform_0, window_bounds = array<i64: 128, 16>}, {transform_indices = @transform_1, window_bounds = array<i64: 8, 1>}, {transform_indices = @transform_2, window_bounds = array<i64: 8, 1>}, {transform_indices = @transform_3, window_bounds = array<i64: 8, 1>}, {transform_indices = @transform_4, window_bounds = array<i64: 8, 1>}, {transform_indices = @transform_5, window_bounds = array<i64: 1, 128>}, {transform_indices = @transform_6, window_bounds = array<i64: 8, 128>}]} {
    %c0_i32 = arith.constant 0 : i32
    %0 = arith.cmpi eq, %arg1, %c0_i32 : i32
    %1 = arith.extui %0 : i1 to i32
    %c0_i32_0 = arith.constant 0 : i32
    %2 = arith.cmpi ne, %1, %c0_i32_0 : i32
    scf.if %2 {
      %c0_19 = arith.constant 0 : index
      %c0_20 = arith.constant 0 : index
      %26 = vector.load %arg3[%c0_19, %c0_20] : memref<8x1xi32, #tpu.memory_space<vmem>>, vector<8x1xi32>
      %27 = tpu.iota {dimensions = array<i32: 1>} : vector<8x16xi32>
      %28 = vector.broadcast %26 : vector<8x1xi32> to vector<8x16xi32>
      %29 = arith.cmpi eq, %27, %28 : vector<8x16xi32>
      %30 = arith.extui %29 : vector<8x16xi1> to vector<8x16xi32>
      %31 = arith.sitofp %30 : vector<8x16xi32> to vector<8x16xf32>
      %c0_21 = arith.constant 0 : index
      %c0_22 = arith.constant 0 : index
      %32 = vector.load %arg9[%c0_21, %c0_22] : memref<8x16xf32, #tpu.memory_space<vmem>>, vector<8x16xf32>
      tpu.vector_store %arg9[%c0_21, %c0_22], %31 {strides = array<i32>} : memref<8x16xf32, #tpu.memory_space<vmem>>, vector<8x16xf32>,
      %cst_23 = arith.constant 0.000000e+00 : f32
      %33 = vector.broadcast %cst_23 : f32 to vector<8x128xf32>
      %c0_24 = arith.constant 0 : index
      %c0_25 = arith.constant 0 : index
      %34 = vector.load %arg8[%c0_24, %c0_25] : memref<8x128xf32, #tpu.memory_space<vmem>>, vector<8x128xf32>
      tpu.vector_store %arg8[%c0_24, %c0_25], %33 {strides = array<i32>} : memref<8x128xf32, #tpu.memory_space<vmem>>, vector<8x128xf32>,
    } else {
    }
    %c0 = arith.constant 0 : index
    %c0_1 = arith.constant 0 : index
    %3 = vector.load %arg9[%c0, %c0_1] : memref<8x16xf32, #tpu.memory_space<vmem>>, vector<8x16xf32>
    %c0_2 = arith.constant 0 : index
    %c0_3 = arith.constant 0 : index
    %4 = vector.load %arg2[%c0_2, %c0_3] : memref<128x16xf32, #tpu.memory_space<vmem>>, vector<128x16xf32>
    %cst = arith.constant dense<0.000000e+00> : vector<8x128xf32>
    %5 = tpu.matmul %3, %4, %cst {dimension_numbers = #tpu.dot_dimension_numbers<[1], [1], [0], [0], [0, 0, 1, 0], [], []>, precision = #tpu.contract_precision<fp32>} : vector<8x16xf32>, vector<128x16xf32>, vector<8x128xf32> -> vector<8x128xf32>
    %c0_4 = arith.constant 0 : index
    %c0_5 = arith.constant 0 : index
    %6 = vector.load %arg5[%c0_4, %c0_5] : memref<8x1xf32, #tpu.memory_space<vmem>>, vector<8x1xf32>
    %c0_6 = arith.constant 0 : index
    %c0_7 = arith.constant 0 : index
    %7 = vector.load %arg7[%c0_6, %c0_7] : memref<1x128xf32, #tpu.memory_space<vmem>>, vector<1x128xf32>
    %8 = vector.broadcast %6 : vector<8x1xf32> to vector<8x128xf32>
    %9 = vector.broadcast %7 : vector<1x128xf32> to vector<8x128xf32>
    %10 = arith.cmpf olt, %8, %9 : vector<8x128xf32>
    %c0_8 = arith.constant 0 : index
    %c0_9 = arith.constant 0 : index
    %11 = vector.load %arg6[%c0_8, %c0_9] : memref<8x1xf32, #tpu.memory_space<vmem>>, vector<8x1xf32>
    %cst_10 = arith.constant 1.000000e+00 : f32
    %12 = vector.broadcast %cst_10 : f32 to vector<8x1xf32>
    %13 = arith.cmpf oeq, %11, %12 : vector<8x1xf32>
    %14 = vector.broadcast %13 : vector<8x1xi1> to vector<8x128xi1>
    %15 = arith.andi %10, %14 : vector<8x128xi1>
    %c0_11 = arith.constant 0 : index
    %c0_12 = arith.constant 0 : index
    %16 = vector.load %arg8[%c0_11, %c0_12] : memref<8x128xf32, #tpu.memory_space<vmem>>, vector<8x128xf32>
    %c0_13 = arith.constant 0 : index
    %c0_14 = arith.constant 0 : index
    %17 = vector.load %arg4[%c0_13, %c0_14] : memref<8x1xf32, #tpu.memory_space<vmem>>, vector<8x1xf32>
    %18 = vector.broadcast %17 : vector<8x1xf32> to vector<8x128xf32>
    %19 = arith.subf %5, %18 : vector<8x128xf32>
    %cst_15 = arith.constant 0.000000e+00 : f32
    %20 = vector.broadcast %cst_15 : f32 to vector<8x128xf32>
    %21 = arith.maximumf %19, %20 : vector<8x128xf32>
    %cst_16 = arith.constant 0.000000e+00 : f32
    %22 = vector.broadcast %cst_16 : f32 to vector<8x128xf32>
    %23 = arith.select %15, %21, %22 : vector<8x128xi1>, vector<8x128xf32>
    %24 = arith.addf %16, %23 : vector<8x128xf32>
    %c0_17 = arith.constant 0 : index
    %c0_18 = arith.constant 0 : index
    %25 = vector.load %arg8[%c0_17, %c0_18] : memref<8x128xf32, #tpu.memory_space<vmem>>, vector<8x128xf32>
    tpu.vector_store %arg8[%c0_17, %c0_18], %24 {strides = array<i32>} : memref<8x128xf32, #tpu.memory_space<vmem>>, vector<8x128xf32>,
    return
  }
  func.func @transform_0(%arg0: i32, %arg1: i32) -> (i32, i32) {
    %c0_i32 = arith.constant 0 : i32
    %c0_i32_0 = arith.constant 0 : i32
    return %arg1, %c0_i32 : i32, i32
  }
  func.func @transform_1(%arg0: i32, %arg1: i32) -> (i32, i32) {
    %c0_i32 = arith.constant 0 : i32
    %c0_i32_0 = arith.constant 0 : i32
    return %arg0, %c0_i32 : i32, i32
  }
  func.func @transform_2(%arg0: i32, %arg1: i32) -> (i32, i32) {
    %c0_i32 = arith.constant 0 : i32
    %c0_i32_0 = arith.constant 0 : i32
    return %arg0, %c0_i32 : i32, i32
  }
  func.func @transform_3(%arg0: i32, %arg1: i32) -> (i32, i32) {
    %c0_i32 = arith.constant 0 : i32
    %c0_i32_0 = arith.constant 0 : i32
    return %arg0, %c0_i32 : i32, i32
  }
  func.func @transform_4(%arg0: i32, %arg1: i32) -> (i32, i32) {
    %c0_i32 = arith.constant 0 : i32
    %c0_i32_0 = arith.constant 0 : i32
    return %arg0, %c0_i32 : i32, i32
  }
  func.func @transform_5(%arg0: i32, %arg1: i32) -> (i32, i32) {
    %c0_i32 = arith.constant 0 : i32
    %c0_i32_0 = arith.constant 0 : i32
    return %c0_i32, %arg1 : i32, i32
  }
  func.func @transform_6(%arg0: i32, %arg1: i32) -> (i32, i32) {
    %c0_i32 = arith.constant 0 : i32
    %c0_i32_0 = arith.constant 0 : i32
    return %arg0, %c0_i32 : i32, i32
  }
}

</mosaic_0001>

<bundles_post_ra>
// kernel: tpu_custom_call.1
= control target key start
LH: loop header
LB: loop body
LE: loop exit
PB: predicated region body
PF: predicated region fallthrough
CT: control target
= control target key end

     0   :  { %vm37_vm0 = vcmask 130048   ;;  %v530_v2 = vmov 0   ;;  %s878_s0 = inlined_call_operand.vmem [shape: f32[128,16], index: 0, kind: input, shape index: {}]   ;;  %s879_s1 = inlined_call_operand.vmem [shape: s32[8,1], index: 1, kind: input, shape index: {}]   ;;  %s880_s2 = inlined_call_operand.vmem [shape: f32[8,1], index: 2, kind: input, shape index: {}]   ;;  %s881_s3 = inlined_call_operand.vmem [shape: f32[8,1], index: 3, kind: input, shape index: {}]   ;;  %s882_s4 = inlined_call_operand.vmem [shape: f32[8,1], index: 4, kind: input, shape index: {}]   ;;  %s883_s5 = inlined_call_operand.vmem [shape: f32[1,128], index: 5, kind: input, shape index: {}]   ;;  %s884_s6 = inlined_call_operand.hbm [shape: f32[8,128], index: 6, kind: output, shape index: {}]  }
   0x1   :  { %v28_v0 = vld [vmem:[%s879_s1] sm:$0xff]  ;;  %v56_v1 = vld [vmem:[%s878_s0 + $0x78] sm:$0xff]  ;;  %501 = vset.pattern.permute.xlu0 %v530_v2  ;;  %v55_v4 = vld [vmem:[%s878_s0 + $0x70] sm:$0xff]  ;;  %502 = vset.pattern.permute.xlu1 %v530_v2 }
   0x2   :  { %v107_v3 = vsel %vm37_vm0, %v56_v1, 0  ;;  %v54_v5 = vld [vmem:[%s878_s0 + $0x68] sm:$0xff]  ;;  %v53_v6 = vld [vmem:[%s878_s0 + $0x60] sm:$0xff]  ;;  %32 = vperm.xlu0 %501, %v28_v0   ;;  %v104_v8 = vsel %vm37_vm0, %v55_v4, 0  ;;  %v52_v11 = vld [vmem:[%s878_s0 + $0x58] sm:$0xff] }
   0x3   :  { %v586_v7 = vand.u32 4294901760, %v107_v3  ;;  %v101_v9 = vsel %vm37_vm0, %v54_v5, 0  ;;  %v98_v10 = vsel %vm37_vm0, %v53_v6, 0  ;;  %v594_v12 = vand.u32 4294901760, %v104_v8  ;;  %v51_v19 = vld [vmem:[%s878_s0 + $0x50] sm:$0xff] }
   0x4   :  { %v596_v13 = vand.u32 4294901760, %v101_v9  ;;  %v602_v15 = vand.u32 4294901760, %v98_v10  ;;  %v95_v16 = vsel %vm37_vm0, %v52_v11, 0 }
   0x5   :  { %v599_v14 = vsub.f32 %v107_v3, %v586_v7  ;;  %110 = vmatpush.xpose.msra.mxu0 %v586_v7  ;;  %306 = vmatpush.xpose.msra.mxu3 %v586_v7  ;;  %v607_v17 = vsub.f32 %v104_v8, %v594_v12 }
   0x6   :  { %v610_v18 = vsub.f32 %v101_v9, %v596_v13 }
   0x7   :  { %11 = vsyncpa [#allocation4], 0  ;;  %v152_v20 = vand.u32 4294901760, %v599_v14  ;;  %253 = vmatpush.xpose.msra.mxu2 %v599_v14  ;;  %v470_v21 = vld [vmem:[%s880_s2] sm:$0xff]  ;;  %v158_v22 = vand.u32 4294901760, %v607_v17  ;;  %v621_v23 = vand.u32 4294901760, %v95_v16  ;;  %v629_v26 = vsub.f32 %v98_v10, %v602_v15 }
   0x8   :  { %v164_v25 = vand.u32 4294901760, %v610_v18  ;;  %v92_v27 = vsel %vm37_vm0, %v51_v19, 0  ;;  %v50_v28 = vld [vmem:[%s878_s0 + $0x48] sm:$0xff]  ;;  %v49_v37 = vld [vmem:[%s878_s0 + $0x40] sm:$0xff]  ;;  %v48_v44 = vld [vmem:[%s878_s0 + $0x38] sm:$0xff]  ;;  %s532_s9 = smov [#allocation3]  }
   0x9   :  { %v153_v24 = vsub.f32 %v599_v14, %v152_v20  ;;  %112 = vmatpush.xpose.msra.mxu0 %v594_v12  ;;  %308 = vmatpush.xpose.msra.mxu3 %v594_v12  ;;  %v159_v29 = vsub.f32 %v607_v17, %v158_v22  ;;  %v640_v31 = vand.u32 4294901760, %v92_v27  ;;  %v89_v32 = vsel %vm37_vm0, %v50_v28, 0  ;;  %v47_v51 = vld [vmem:[%s878_s0 + $0x30] sm:$0xff]  ;;  %v46_v58 = vld [vmem:[%s878_s0 + $0x28] sm:$0xff]  ;;  %v45_v1 = vld [vmem:[%s878_s0 + $0x20] sm:$0xff]  ;;  %s486_s10 = sshll.u32 %s532_s9, 4  ;;  %s487_s10 = int_to_ptr.vmem [resolvable:$true] %s486_s10 }
   0xa   :  { %473 = vperm.xlu0 %501, %v470_v21   ;;  %v165_v34 = vsub.f32 %v610_v18, %v164_v25  ;;  %v170_v35 = vand.u32 4294901760, %v629_v26  ;;  %v649_v36 = vsub.f32 %v95_v16, %v621_v23  ;;  %v656_v38 = vand.u32 4294901760, %v89_v32  ;;  %v44_v10 = vld [vmem:[%s878_s0 + $0x18] sm:$0xff]  ;;  %v43_v28 = vld [vmem:[%s878_s0 + $0x10] sm:$0xff]  ;;  %v461_v14 = vld [vmem:[%s882_s4] sm:$0xff]  ;;  %s488_s13 = sshll.u32 %s884_s6, 4  ;;  %s489_s13 = int_to_ptr.hbm [resolvable:$true] %s488_s13 }
   0xb   :  { %v154_v30 = vand.u32 4294901760, %v153_v24  ;;  %256 = vmatpush.xpose.msra.mxu2 %v607_v17  ;;  %v160_v33 = vand.u32 4294901760, %v159_v29  ;;  %v86_v39 = vsel %vm37_vm0, %v49_v37, 0  ;;  %v665_v43 = vsub.f32 %v92_v27, %v640_v31 }
   0xc   :  { %v166_v40 = vand.u32 4294901760, %v165_v34  ;;  %v171_v41 = vsub.f32 %v629_v26, %v170_v35  ;;  %v176_v42 = vand.u32 4294901760, %v649_v36  ;;  %v673_v45 = vsub.f32 %v89_v32, %v656_v38 }
   0xd   :  { %155 = vmatpush.xpose.msra.mxu1 %v154_v30  ;;  %114 = vmatpush.xpose.msra.mxu0 %v596_v13  ;;  %v675_v46 = vand.u32 4294901760, %v86_v39  ;;  %v182_v49 = vand.u32 4294901760, %v665_v43  ;;  %v83_v50 = vsel %vm37_vm0, %v48_v44, 0  ;;  %v80_v57 = vsel %vm37_vm0, %v47_v51, 0  ;;  %v41_v51 = vld [vmem:[%s878_s0] sm:$0xff] }
   0xe   :  { %310 = vmatpush.xpose.msra.mxu3 %v596_v13  ;;  %v172_v47 = vand.u32 4294901760, %v171_v41  ;;  %v177_v48 = vsub.f32 %v649_v36, %v176_v42  ;;  %v188_v52 = vand.u32 4294901760, %v673_v45  ;;  %v696_v56 = vand.u32 4294901760, %v83_v50 }
   0xf   :  { %259 = vmatpush.xpose.msra.mxu2 %v610_v18  ;;  %v690_v53 = vsub.f32 %v86_v39, %v675_v46  ;;  %v183_v55 = vsub.f32 %v665_v43, %v182_v49  ;;  %v712_v63 = vand.u32 4294901760, %v80_v57  ;;  %v77_v0 = vsel %vm37_vm0, %v46_v58, 0  ;;  %v42_v39 = vld [vmem:[%s878_s0 + $0x8] sm:$0xff] }
  0x10   :  { %v178_v54 = vand.u32 4294901760, %v177_v48  ;;  %v189_v59 = vsub.f32 %v673_v45, %v188_v52  ;;  %v710_v62 = vsub.f32 %v83_v50, %v696_v56  ;;  %v728_v8 = vand.u32 4294901760, %v77_v0 }
  0x11   :  { %161 = vmatpush.xpose.msra.mxu1 %v160_v33  ;;  %116 = vmatpush.xpose.msra.mxu0 %v602_v15  ;;  %v194_v60 = vand.u32 4294901760, %v690_v53  ;;  %v184_v61 = vand.u32 4294901760, %v183_v55  ;;  %v726_v6 = vsub.f32 %v80_v57, %v712_v63  ;;  %v74_v9 = vsel %vm37_vm0, %v45_v1, 0 }
  0x12   :  { %312 = vmatpush.xpose.msra.mxu3 %v602_v15  ;;  %v190_v3 = vand.u32 4294901760, %v189_v59  ;;  %v200_v5 = vand.u32 4294901760, %v710_v62  ;;  %v736_v11 = vand.u32 4294901760, %v74_v9  ;;  %v744_v24 = vsub.f32 %v77_v0, %v728_v8 }
  0x13   :  { %262 = vmatpush.xpose.msra.mxu2 %v629_v26  ;;  %v195_v4 = vsub.f32 %v690_v53, %v194_v60  ;;  %v206_v21 = vand.u32 4294901760, %v726_v6  ;;  %v71_v27 = vsel %vm37_vm0, %v44_v10, 0  ;;  %v68_v37 = vsel %vm37_vm0, %v43_v28, 0 }
  0x14   :  { %v201_v19 = vsub.f32 %v710_v62, %v200_v5  ;;  %v753_v29 = vsub.f32 %v74_v9, %v736_v11  ;;  %v212_v33 = vand.u32 4294901760, %v744_v24  ;;  %v760_v34 = vand.u32 4294901760, %v71_v27 }
  0x15   :  { %167 = vmatpush.xpose.msra.mxu1 %v166_v40  ;;  %118 = vmatpush.xpose.msra.mxu0 %v621_v23  ;;  %v196_v16 = vand.u32 4294901760, %v195_v4  ;;  %v207_v32 = vsub.f32 %v726_v6, %v206_v21  ;;  %v776_v48 = vand.u32 4294901760, %v68_v37  ;;  %v65_v50 = vsel %vm37_vm0, %v42_v39, 0 }
  0x16   :  { %314 = vmatpush.xpose.msra.mxu3 %v621_v23  ;;  %v202_v30 = vand.u32 4294901760, %v201_v19  ;;  %v218_v40 = vand.u32 4294901760, %v753_v29  ;;  %v213_v44 = vsub.f32 %v744_v24, %v212_v33  ;;  %v792_v59 = vand.u32 4294901760, %v65_v50 }
  0x17   :  { %265 = vmatpush.xpose.msra.mxu2 %v649_v36  ;;  %v208_v41 = vand.u32 4294901760, %v207_v32  ;;  %v790_v58 = vsub.f32 %v68_v37, %v776_v48  ;;  %vm462_vm2 = vcmp.eq.f32.partialorder %v461_v14, 1.0  ;;  %v531_v17 = vmov 0.0  }
  0x18   :  { %v214_v55 = vand.u32 4294901760, %v213_v44  ;;  %v803_v4 = vsub.f32 %v65_v50, %v792_v59 }
  0x19   :  { %173 = vmatpush.xpose.msra.mxu1 %v172_v47  ;;  %120 = vmatpush.xpose.msra.mxu0 %v640_v31  ;;  %v774_v47 = vsub.f32 %v71_v27, %v760_v34 }
  0x1a   :  { %316 = vmatpush.xpose.msra.mxu3 %v640_v31  ;;  %v236_v19 = vand.u32 4294901760, %v803_v4 }
  0x1b   :  { %268 = vmatpush.xpose.msra.mxu2 %v665_v43  ;;  %v224_v57 = vand.u32 4294901760, %v774_v47 }
  0x1d   :  { %179 = vmatpush.xpose.msra.mxu1 %v178_v54  ;;  %122 = vmatpush.xpose.msra.mxu0 %v656_v38  ;;  %v219_v54 = vsub.f32 %v753_v29, %v218_v40  ;;  %v225_v1 = vsub.f32 %v774_v47, %v224_v57 }
  0x1e   :  { %318 = vmatpush.xpose.msra.mxu3 %v656_v38 }
  0x1f   :  { %271 = vmatpush.xpose.msra.mxu2 %v673_v45  ;;  %v220_v0 = vand.u32 4294901760, %v219_v54  ;;  %v226_v10 = vand.u32 4294901760, %v225_v1 }
  0x21   :  { %185 = vmatpush.xpose.msra.mxu1 %v184_v61  ;;  %124 = vmatpush.xpose.msra.mxu0 %v675_v46  ;;  %v62_v61 = vsel %vm37_vm0, %v41_v51, 0 }
  0x22   :  { %320 = vmatpush.xpose.msra.mxu3 %v675_v46  ;;  %v805_v9 = vand.u32 4294901760, %v62_v61 }
  0x23   :  { %274 = vmatpush.xpose.msra.mxu2 %v690_v53 }
  0x24   :  { %v241_v27 = vsub.f32 %v62_v61, %v805_v9 }
  0x25   :  { %191 = vmatpush.xpose.msra.mxu1 %v190_v3  ;;  %126 = vmatpush.xpose.msra.mxu0 %v696_v56  ;;  %v230_v3 = vand.u32 4294901760, %v790_v58 }
  0x26   :  { %322 = vmatpush.xpose.msra.mxu3 %v696_v56  ;;  %v242_v32 = vand.u32 4294901760, %v241_v27 }
  0x27   :  { %277 = vmatpush.xpose.msra.mxu2 %v710_v62 }
  0x28   :  { %v243_v39 = vsub.f32 %v241_v27, %v242_v32 }
  0x29   :  { %197 = vmatpush.xpose.msra.mxu1 %v196_v16  ;;  %128 = vmatpush.xpose.msra.mxu0 %v712_v63  ;;  %v231_v16 = vsub.f32 %v790_v58, %v230_v3 }
  0x2a   :  { %324 = vmatpush.xpose.msra.mxu3 %v712_v63 }
  0x2b   :  { %280 = vmatpush.xpose.msra.mxu2 %v726_v6  ;;  %v232_v28 = vand.u32 4294901760, %v231_v16 }
  0x2d   :  { %203 = vmatpush.xpose.msra.mxu1 %v202_v30  ;;  %130 = vmatpush.xpose.msra.mxu0 %v728_v8  ;;  %v237_v30 = vsub.f32 %v803_v4, %v236_v19 }
  0x2e   :  { %326 = vmatpush.xpose.msra.mxu3 %v728_v8 }
  0x2f   :  { %283 = vmatpush.xpose.msra.mxu2 %v744_v24  ;;  %v238_v37 = vand.u32 4294901760, %v237_v30 }
  0x31   :  { %209 = vmatpush.xpose.msra.mxu1 %v208_v41  ;;  %132 = vmatpush.xpose.msra.mxu0 %v736_v11  ;;  %v244_v41 = vand.u32 4294901760, %v243_v39 }
  0x32   :  { %328 = vmatpush.xpose.msra.mxu3 %v736_v11 }
  0x33   :  { %286 = vmatpush.xpose.msra.mxu2 %v753_v29 }
  0x35   :  { %215 = vmatpush.xpose.msra.mxu1 %v214_v55  ;;  %134 = vmatpush.xpose.msra.mxu0 %v760_v34 }
  0x36   :  { %330 = vmatpush.xpose.msra.mxu3 %v760_v34 }
  0x37   :  { %289 = vmatpush.xpose.msra.mxu2 %v774_v47 }
  0x39   :  { %221 = vmatpush.xpose.msra.mxu1 %v220_v0  ;;  %136 = vmatpush.xpose.msra.mxu0 %v776_v48 }
  0x3a   :  { %332 = vmatpush.xpose.msra.mxu3 %v776_v48 }
  0x3b   :  { %292 = vmatpush.xpose.msra.mxu2 %v790_v58 }
  0x3d   :  { %227 = vmatpush.xpose.msra.mxu1 %v226_v10  ;;  %138 = vmatpush.xpose.msra.mxu0 %v792_v59 }
  0x3e   :  { %334 = vmatpush.xpose.msra.mxu3 %v792_v59 }
  0x3f   :  { %295 = vmatpush.xpose.msra.mxu2 %v803_v4 }
  0x41   :  { %233 = vmatpush.xpose.msra.mxu1 %v232_v28  ;;  %140 = vmatpush.xpose.msra.mxu0 %v805_v9 }
  0x42   :  { %336 = vmatpush.xpose.msra.mxu3 %v805_v9 }
  0x43   :  { %298 = vmatpush.xpose.msra.mxu2 %v241_v27 }
  0x45   :  { %347 = vmatpush.xpose.msrb.mxu0 %v152_v20  ;;  %239 = vmatpush.xpose.msra.mxu1 %v238_v37  ;;  %v463_v20 = vsel %vm462_vm2, 1, %v530_v2 }
  0x49   :  { %351 = vmatpush.xpose.msrb.mxu0 %v158_v22  ;;  %245 = vmatpush.xpose.msra.mxu1 %v244_v41 }
  0x4d   :  { %414 = vmatpush.xpose.msrb.mxu1 %v586_v7  ;;  %355 = vmatpush.xpose.msrb.mxu0 %v164_v25  ;;  %v29_v7 = vlaneseq }
  0x51   :  { %416 = vmatpush.xpose.msrb.mxu1 %v594_v12  ;;  %359 = vmatpush.xpose.msrb.mxu0 %v170_v35  ;;  %v30_v12 = vand.u32 127, %v29_v7 }
  0x55   :  { %418 = vmatpush.xpose.msrb.mxu1 %v596_v13  ;;  %363 = vmatpush.xpose.msrb.mxu0 %v176_v42  ;;  %v450_v13 = vld [vmem:[%s881_s3] sm:$0xff] }
  0x56   :  { %454 = vperm.xlu1 %502, %v450_v13  }
  0x59   :  { %420 = vmatpush.xpose.msrb.mxu1 %v602_v15  ;;  %367 = vmatpush.xpose.msrb.mxu0 %v182_v49 }
  0x5d   :  { %422 = vmatpush.xpose.msrb.mxu1 %v621_v23  ;;  %371 = vmatpush.xpose.msrb.mxu0 %v188_v52 }
  0x5e   :  { %465 = vperm.xlu1 %502, %v463_v20  }
  0x61   :  { %424 = vmatpush.xpose.msrb.mxu1 %v640_v31  ;;  %375 = vmatpush.xpose.msrb.mxu0 %v194_v60 }
  0x65   :  { %426 = vmatpush.xpose.msrb.mxu1 %v656_v38  ;;  %379 = vmatpush.xpose.msrb.mxu0 %v200_v5 }
  0x69   :  { %428 = vmatpush.xpose.msrb.mxu1 %v675_v46  ;;  %383 = vmatpush.xpose.msrb.mxu0 %v206_v21 }
  0x6d   :  { %430 = vmatpush.xpose.msrb.mxu1 %v696_v56  ;;  %387 = vmatpush.xpose.msrb.mxu0 %v212_v33  ;;  %v503_v56 = vld [vmem:[%s883_s5] ss:$0 sm:$0xff] }
  0x71   :  { %432 = vmatpush.xpose.msrb.mxu1 %v712_v63  ;;  %391 = vmatpush.xpose.msrb.mxu0 %v218_v40 }
  0x74   :  { %v33_v15 = vpop.permute.xlu0 %32 }
  0x75   :  { %434 = vmatpush.xpose.msrb.mxu1 %v728_v8  ;;  %395 = vmatpush.xpose.msrb.mxu0 %v224_v57  ;;  %vm34_vm1 = vcmp.eq.s32.totalorder %v30_v12, %v33_v15 }
  0x76   :  { %v497_v18 = vsel %vm34_vm1, 1.0, %v531_v17 }
  0x77   :  { %38 = vst.msk [vmem:[#allocation2] sm:$0xff] %vm37_vm0, %v497_v18 }
  0x79   :  { %436 = vmatpush.xpose.msrb.mxu1 %v736_v11  ;;  %399 = vmatpush.xpose.msrb.mxu0 %v230_v3 }
  0x7c   :  { %v474_v6 = vpop.permute.xlu0 %473 }
  0x7d   :  { %438 = vmatpush.xpose.msrb.mxu1 %v760_v34  ;;  %403 = vmatpush.xpose.msrb.mxu0 %v236_v19 }
  0x7e   :  { %v40_v22 = vld [vmem:[#allocation2] sm:$0xff] }
  0x7f   :  { %v59_v23 = vsel %vm37_vm0, %v40_v22, 0 }
  0x80   :  { %v141_v25 = vand.u32 4294901760, %v59_v23 }
  0x81   :  { %440 = vmatpush.xpose.msrb.mxu1 %v776_v48  ;;  %407 = vmatpush.xpose.msrb.mxu0 %v242_v32 }
  0x82   :  { %247 = vmatmul.f32.vlgmr.msra.gmra.mxu1 %v141_v25  ;;  %v142_v26 = vsub.f32 %v59_v23, %v141_v25 }
  0x84   :  { %301 = vmatmul.f32.vlgmr.msra.gmra.mxu2 %v142_v26  ;;  %v143_v31 = vand.u32 4294901760, %v142_v26 }
  0x85   :  { %442 = vmatpush.xpose.msrb.mxu1 %v792_v59 }
  0x86   :  { %340 = vmatmul.f32.vlgmr.msra.gmra.mxu3 %v143_v31  ;;  %v144_v2 = vsub.f32 %v142_v26, %v143_v31 }
  0x88   :  { %v145_v35 = vand.u32 4294901760, %v144_v2 }
  0x89   :  { %444 = vmatpush.xpose.msrb.mxu1 %v805_v9 }
  0x8a   :  { %146 = vmatmul.f32.vlgmr.msra.gmra.mxu0 %v145_v35 }
  0x8c   :  { %446 = vmatmul.f32.vlgmr.msrb.gmra.mxu1 %v141_v25 }
  0x92   :  { %409 = vmatmul.f32.vlgmr.msrb.gmra.mxu0 %v141_v25 }
  0xc8   :  { %v455_v36 = vpop.permute.xlu1 %454 }
  0xc9   :  { %vm460_vm3 = vcmp.lt.f32.partialorder %v455_v36, %v503_v56 }
  0xd0   :  { %v466_v63 = vpop.permute.xlu1 %465 }
  0xd1   :  { %vm467_vm4 = vcmp.eq.s32.totalorder %v466_v63, 1 }
  0xd2   :  { %vm468_vm5 = vmand %vm460_vm3, %vm467_vm4 }
  0xff   :  { %v248_v38 = vpop.f32.mrf.mxu1 }
 0x107   :  { %v147_v42 = vpop.f32.mrf.mxu0  ;;  %v302_v45 = vpop.f32.mrf.mxu2 }
 0x108   :  { %v249_v43 = vadd.f32 %v248_v38, %v147_v42 }
 0x109   :  { %v341_v49 = vpop.f32.mrf.mxu3  ;;  %v447_v62 = vpop.f32.mrf.mxu1 }
 0x10a   :  { %v303_v46 = vadd.f32 %v302_v45, %v249_v43 }
 0x10c   :  { %v342_v52 = vadd.f32 %v341_v49, %v303_v46 }
 0x10f   :  { %v410_v53 = vpop.f32.mrf.mxu0 }
 0x110   :  { %v411_v60 = vadd.f32 %v410_v53, %v342_v52 }
 0x112   :  { %v448_v5 = vadd.f32 %v447_v62, %v411_v60 }
 0x114   :  { %v476_v8 = vsub.f32 %v448_v5, %v474_v6 }
 0x116   :  { %v477_v11 = vmax.f32 %v476_v8, 0.0 }
 0x118   :  { %v478_v21 = vsel %vm468_vm5, %v477_v11, 0.0 }
 0x119   :  { %480 = vst [vmem:[#allocation3] sm:$0xff] %v478_v21 }
 0x11a   :  { %491 = dma.vmem_to_hbm [thread:$0]  %s487_s10, 128, %s489_s13, [#allocation4]  }
 0x11b   :  { %528 = dma.done.wait [#allocation4], 128  }
 0x11c   :  { %529 = vsyncadd [#allocation4], 4294967168 }
 0x11d   :  { %496 = vsyncpa [#allocation4], 1 }

</bundles_post_ra>
